<compile_context>
chip_gen: v6e
topology: v6e:2x2x1
jax: 0.10.0
libtpu: 0.0.40
codegen_flags: <defaults>
</compile_context>

<pallas_src>
import functools

import jax
import jax.numpy as jnp
from jax import lax
from jax.experimental import pallas as pl
from jax.experimental.pallas import tpu as pltpu


def _round_up(n, m):
    return ((n + m - 1) // m) * m


def deep_sets_kernel(x_ref,
                     w1_ref, b1_ref, w2_ref, b2s_ref,   # phi params (b2 pre-scaled by S)
                     w3_ref, b3_ref, w4_ref, b4_ref,    # f params
                     o_ref, *, tile_b, set_size, set_pad):
    """One batch tile: phi layer-1 per set element, pool, hoisted phi layer-2,
    then f (Linear -> ReLU -> Linear).  Matmul operands are in the weights'
    dtype (bf16 path); accumulation and elementwise math are f32."""
    hidden = w1_ref.shape[1]

    # ---- phi layer 1 on all set elements of the tile: (tile_b*S_pad, D)@(D,H)
    h = jnp.dot(x_ref[...], w1_ref[...], preferred_element_type=jnp.float32)
    h = jnp.maximum(h + b1_ref[...], 0.0)                 # bias already f32

    # ---- pool over the set axis BEFORE the second phi Linear ----------------
    # set_pad % 8 == 0, so this reshape is a free (8,128)-aligned view.
    h3 = h.reshape(tile_b, set_pad, hidden)
    if set_pad != set_size:
        # zero-padded set elements would contribute ReLU(b1); mask them out.
        sidx = lax.broadcasted_iota(jnp.int32, (tile_b, set_pad, 1), 1)
        h3 = jnp.where(sidx < set_size, h3, 0.0)
    pooled = jnp.sum(h3, axis=1)                          # (tile_b, hidden) f32

    # ---- hoisted phi layer 2 (bias pre-scaled by true set size) -------------
    phi = jnp.dot(pooled.astype(w2_ref.dtype), w2_ref[...],
                  preferred_element_type=jnp.float32) + b2s_ref[...]

    # ---- f: Linear -> ReLU -> Linear ----------------------------------------
    h2 = jnp.maximum(
        jnp.dot(phi.astype(w3_ref.dtype), w3_ref[...],
                preferred_element_type=jnp.float32) + b3_ref[...], 0.0)
    out = jnp.dot(h2.astype(w4_ref.dtype), w4_ref[...],
                  preferred_element_type=jnp.float32) + b4_ref[...]

    o_ref[...] = out.astype(o_ref.dtype)


def _vmem_bytes(tile_b, set_pad, d, hidden, phi_dim, f_hid, out_pad,
                x_item, w_item, weight_bufs):
    """VMEM footprint estimate using padded-to-(8,128) physical tile sizes."""
    lane = lambda n: _round_up(n, 128)
    rows = tile_b * set_pad
    x_blk = 2 * rows * lane(d) * x_item                      # double-buffered x
    out_blk = 2 * _round_up(tile_b, 8) * lane(out_pad) * 4   # double-buffered out
    weights = weight_bufs * w_item * (
        _round_up(d, 16) * lane(hidden)
        + _round_up(hidden, 16) * lane(phi_dim)
        + _round_up(phi_dim, 16) * lane(f_hid)
        + _round_up(f_hid, 16) * lane(out_pad))
    biases = weight_bufs * 8 * 4 * (lane(hidden) + lane(phi_dim)
                                    + lane(f_hid) + lane(out_pad))
    h_act = rows * lane(hidden) * 4                          # f32 intermediate
    small = _round_up(tile_b, 8) * (lane(hidden) + lane(phi_dim)
                                    + lane(f_hid) + lane(out_pad)) * (4 + w_item)
    return x_blk + out_blk + weights + biases + h_act + small + (2 << 20)


def deep_sets_encoder(x, params, *, compute_dtype=jnp.bfloat16, target_rows=1024):
    """x: (B, S, in_dim).  params: dict of (in,out) weights and (1,out) biases."""
    B, S, D = x.shape
    hidden = params["w1"].shape[1]
    phi_dim = params["w2"].shape[1]
    f_hid = params["w3"].shape[1]
    out_dim = params["w4"].shape[1]

    out_pad = _round_up(out_dim, 128)     # lane-dense output -> unmasked stores
    s_pad = _round_up(S, 8)               # pooling reshape stays a free view

    w_item = jnp.dtype(compute_dtype).itemsize
    x_item = w_item

    # --- generation-aware VMEM budget (v7x: 64 MiB per TensorCore) -----------
    try:
        vmem_cap = int(pltpu.get_tpu_info().vmem_capacity_bytes)
    except Exception:
        vmem_cap = 64 * 1024 * 1024       # conservative fallback, safe everywhere
    vmem_budget = int(0.8 * vmem_cap)

    # --- batch tile: big enough to feed the MXU / amortize per-step overhead -
    tile_b = max(8, _round_up(-(-target_rows // s_pad), 8))
    tile_b = min(tile_b, _round_up(B, 8))
    while tile_b > 8 and _vmem_bytes(tile_b, s_pad, D, hidden, phi_dim, f_hid,
                                     out_pad, x_item, w_item, 1) > vmem_budget:
        tile_b = max(8, _round_up(tile_b // 2, 8))
    # Keep >= 2 grid steps when the batch allows (v7x has 2 TensorCores that
    # shard the "parallel" axis; the extra step is ~0.35us on v5e/v6e).
    if B > 8 and _round_up(B, tile_b) // tile_b < 2:
        tile_b = max(8, _round_up(-(-B // 2), 8))
    b_pad = _round_up(B, tile_b)
    grid = (b_pad // tile_b,)

    # --- params: bf16 weights, f32 biases (b2 pre-scaled by S), padded w4/b4 -
    w1 = params["w1"].astype(compute_dtype)
    w2 = params["w2"].astype(compute_dtype)
    w3 = params["w3"].astype(compute_dtype)
    w4, b4 = params["w4"], params["b4"]
    if out_pad != out_dim:
        w4 = jnp.pad(w4, ((0, 0), (0, out_pad - out_dim)))
        b4 = jnp.pad(b4, ((0, 0), (0, out_pad - out_dim)))
    w4 = w4.astype(compute_dtype)
    b1 = params["b1"].astype(jnp.float32)
    b2s = (params["b2"] * float(S)).astype(jnp.float32)   # hoisted sum-of-bias
    b3 = params["b3"].astype(jnp.float32)
    b4 = b4.astype(jnp.float32)

    # --- pad batch/set dims with zeros, cast, flatten set elements to rows ---
    xp = x
    if b_pad != B or s_pad != S:
        xp = jnp.pad(x, ((0, b_pad - B), (0, s_pad - S), (0, 0)))
    x2 = xp.astype(compute_dtype).reshape(b_pad * s_pad, D)

    # --- advisory cost estimate (FLOPs reflect the hoisted W2) ---------------
    flops = 2 * b_pad * (s_pad * D * hidden + hidden * phi_dim
                         + phi_dim * f_hid + f_hid * out_pad)
    bytes_w = ((w1.size + w2.size + w3.size + w4.size) * w_item
               + (b1.size + b2s.size + b3.size + b4.size) * 4)
    cost = pl.CostEstimate(
        flops=int(flops), transcendentals=0,
        bytes_accessed=int(x2.size * x_item + bytes_w + b_pad * out_pad * 4))

    vmem_limit = int(min(vmem_budget,
                         max(32 * 1024 * 1024,
                             2 * _vmem_bytes(tile_b, s_pad, D, hidden, phi_dim,
                                             f_hid, out_pad, x_item, w_item, 1))))

    kernel = functools.partial(deep_sets_kernel, tile_b=tile_b,
                               set_size=S, set_pad=s_pad)
    const = lambda i: (0, 0)                       # weights/biases: resident
    args = (x2, w1, b1, w2, b2s, w3, b3, w4, b4)

    def build_and_call(single_buffer_weights):
        wkw = dict(pipeline_mode=pl.Buffered(1)) if single_buffer_weights else {}
        in_specs = [pl.BlockSpec((tile_b * s_pad, D), lambda i: (i, 0))]
        in_specs += [pl.BlockSpec(a.shape, const, **wkw) for a in args[1:]]
        out_specs = pl.BlockSpec((tile_b, out_pad), lambda i: (i, 0))
        return pl.pallas_call(
            kernel,
            out_shape=jax.ShapeDtypeStruct((b_pad, out_pad), jnp.float32),
            grid=grid,
            in_specs=in_specs,
            out_specs=out_specs,
            compiler_params=pltpu.CompilerParams(
                dimension_semantics=("parallel",),
                vmem_limit_bytes=vmem_limit),
            cost_estimate=cost,
        )(*args)

    try:
        out = build_and_call(True)      # single-buffered resident weights
    except Exception:
        out = build_and_call(False)     # fallback: default double-buffering

    return out[:B, :out_dim]


def init_params(key, in_dim, hidden, phi_dim, f_hid, out_dim):
    ks = jax.random.split(key, 8)

    def lin(kw, fan_in, fan_out):
        scale = 1.0 / jnp.sqrt(fan_in)
        return jax.random.uniform(kw, (fan_in, fan_out), jnp.float32, -scale, scale)

    return {
        "w1": lin(ks[0], in_dim, hidden),
        "b1": jax.random.uniform(ks[1], (1, hidden), jnp.float32, -0.1, 0.1),
        "w2": lin(ks[2], hidden, phi_dim),
        "b2": jax.random.uniform(ks[3], (1, phi_dim), jnp.float32, -0.1, 0.1),
        "w3": lin(ks[4], phi_dim, f_hid),
        "b3": jax.random.uniform(ks[5], (1, f_hid), jnp.float32, -0.1, 0.1),
        "w4": lin(ks[6], f_hid, out_dim),
        "b4": jax.random.uniform(ks[7], (1, out_dim), jnp.float32, -0.1, 0.1),
    }


def reference(x, p, compute_dtype=jnp.bfloat16):
    """Pure-JAX forward pass with the same bf16 operand quantization and f32
    accumulation as the kernel (matches the original module's math given the
    bf16-cast parameters)."""
    cd = lambda a: a.astype(compute_dtype)
    S = x.shape[-2]
    h = jnp.maximum(jnp.dot(cd(x), cd(p["w1"]),
                            preferred_element_type=jnp.float32) + p["b1"], 0.0)
    pooled = h.sum(axis=-2)
    phi = jnp.dot(cd(pooled), cd(p["w2"]),
                  preferred_element_type=jnp.float32) + S * p["b2"]
    h2 = jnp.maximum(jnp.dot(cd(phi), cd(p["w3"]),
                             preferred_element_type=jnp.float32) + p["b3"], 0.0)
    return jnp.dot(cd(h2), cd(p["w4"]),
                   preferred_element_type=jnp.float32) + p["b4"]


if __name__ == "__main__":
    key = jax.random.PRNGKey(0)
    k1, k2, k3, k4 = jax.random.split(key, 4)

    # Case 1: lane-dense hidden dims; out_dim=32 exercises the pad-to-128
    # output path; B=16 keeps the grid at 2 steps (megacore-friendly).
    B, S, in_dim = 16, 8, 16
    hidden, phi_dim, f_hid, out_dim = 128, 128, 128, 32
    x = jax.random.normal(k1, (B, S, in_dim), dtype=jnp.float32)
    params = init_params(k2, in_dim, hidden, phi_dim, f_hid, out_dim)
    out = jax.block_until_ready(deep_sets_encoder(x, params))
    ref = reference(x, params)
    assert out.shape == (B, out_dim)
    assert jnp.allclose(out, ref, atol=5e-2, rtol=5e-2), \
        float(jnp.max(jnp.abs(out - ref)))

    # Case 2: set size not a multiple of 8 -> exercises the in-kernel set mask
    # (padded set elements must not contribute ReLU(b1) to the pool).
    B2, S2, in2 = 4, 6, 16
    x2 = jax.random.normal(k3, (B2, S2, in2), dtype=jnp.float32)
    params2 = init_params(k4, in2, 128, 128, 128, 10)
    out2 = jax.block_until_ready(deep_sets_encoder(x2, params2))
    ref2 = reference(x2, params2)
    assert out2.shape == (B2, 10)
    assert jnp.allclose(out2, ref2, atol=5e-2, rtol=5e-2), \
        float(jnp.max(jnp.abs(out2 - ref2)))

    print("KERNEL_OK")
</pallas_src>

<mosaic_0001>
module attributes {stable_mosaic.version = 11 : i64} {
  func.func @deep_sets_kernel(%arg0: i32, %arg1: memref<64x16xbf16, #tpu.memory_space<vmem>>, %arg2: memref<16x128xbf16, #tpu.memory_space<vmem>>, %arg3: memref<1x128xf32, #tpu.memory_space<vmem>>, %arg4: memref<128x128xbf16, #tpu.memory_space<vmem>>, %arg5: memref<1x128xf32, #tpu.memory_space<vmem>>, %arg6: memref<128x128xbf16, #tpu.memory_space<vmem>>, %arg7: memref<1x128xf32, #tpu.memory_space<vmem>>, %arg8: memref<128x128xbf16, #tpu.memory_space<vmem>>, %arg9: memref<1x128xf32, #tpu.memory_space<vmem>>, %arg10: memref<8x128xf32, #tpu.memory_space<vmem>>) attributes {dimension_semantics = [#tpu.dimension_semantics<parallel>], iteration_bounds = array<i64: 2>, scalar_prefetch = 0 : i64, scratch_operands = 0 : i64, tpu.core_type = #tpu.core_type<tc>, window_params = [{transform_indices = @transform_0, window_bounds = array<i64: 64, 16>}, {pipeline_mode = #tpu.pipeline_mode<synchronous>, transform_indices = @transform_1, window_bounds = array<i64: 16, 128>}, {pipeline_mode = #tpu.pipeline_mode<synchronous>, transform_indices = @transform_2, window_bounds = array<i64: 1, 128>}, {pipeline_mode = #tpu.pipeline_mode<synchronous>, transform_indices = @transform_3, window_bounds = array<i64: 128, 128>}, {pipeline_mode = #tpu.pipeline_mode<synchronous>, transform_indices = @transform_4, window_bounds = array<i64: 1, 128>}, {pipeline_mode = #tpu.pipeline_mode<synchronous>, transform_indices = @transform_5, window_bounds = array<i64: 128, 128>}, {pipeline_mode = #tpu.pipeline_mode<synchronous>, transform_indices = @transform_6, window_bounds = array<i64: 1, 128>}, {pipeline_mode = #tpu.pipeline_mode<synchronous>, transform_indices = @transform_7, window_bounds = array<i64: 128, 128>}, {pipeline_mode = #tpu.pipeline_mode<synchronous>, transform_indices = @transform_8, window_bounds = array<i64: 1, 128>}, {transform_indices = @transform_9, window_bounds = array<i64: 8, 128>}]} {
    %c0 = arith.constant 0 : index
    %c0_0 = arith.constant 0 : index
    %0 = vector.load %arg1[%c0, %c0_0] : memref<64x16xbf16, #tpu.memory_space<vmem>>, vector<64x16xbf16>
    %c0_1 = arith.constant 0 : index
    %c0_2 = arith.constant 0 : index
    %1 = vector.load %arg2[%c0_1, %c0_2] : memref<16x128xbf16, #tpu.memory_space<vmem>>, vector<16x128xbf16>
    %cst = arith.constant dense<0.000000e+00> : vector<64x128xf32>
    %2 = tpu.matmul %0, %1, %cst {dimension_numbers = #tpu.dot_dimension_numbers<[1], [0], [0], [1], [0, 0, 1, 1], [], []>} : vector<64x16xbf16>, vector<16x128xbf16>, vector<64x128xf32> -> vector<64x128xf32>
    %c0_3 = arith.constant 0 : index
    %c0_4 = arith.constant 0 : index
    %3 = vector.load %arg3[%c0_3, %c0_4] : memref<1x128xf32, #tpu.memory_space<vmem>>, vector<1x128xf32>
    %4 = vector.broadcast %3 : vector<1x128xf32> to vector<64x128xf32>
    %5 = arith.addf %2, %4 : vector<64x128xf32>
    %cst_5 = arith.constant 0.000000e+00 : f32
    %6 = vector.broadcast %cst_5 : f32 to vector<64x128xf32>
    %7 = arith.maximumf %5, %6 : vector<64x128xf32>
    %8 = vector.shape_cast %7 : vector<64x128xf32> to vector<8x8x128xf32>
    %cst_6 = arith.constant dense<0.000000e+00> : vector<8x128xf32>
    %9 = vector.multi_reduction <add>, %8, %cst_6 [1] : vector<8x8x128xf32> to vector<8x128xf32>
    %10 = arith.truncf %9 : vector<8x128xf32> to vector<8x128xbf16>
    %c0_7 = arith.constant 0 : index
    %c0_8 = arith.constant 0 : index
    %11 = vector.load %arg4[%c0_7, %c0_8] : memref<128x128xbf16, #tpu.memory_space<vmem>>, vector<128x128xbf16>
    %cst_9 = arith.constant dense<0.000000e+00> : vector<8x128xf32>
    %12 = tpu.matmul %10, %11, %cst_9 {dimension_numbers = #tpu.dot_dimension_numbers<[1], [0], [0], [1], [0, 0, 1, 1], [], []>} : vector<8x128xbf16>, vector<128x128xbf16>, vector<8x128xf32> -> vector<8x128xf32>
    %c0_10 = arith.constant 0 : index
    %c0_11 = arith.constant 0 : index
    %13 = vector.load %arg5[%c0_10, %c0_11] : memref<1x128xf32, #tpu.memory_space<vmem>>, vector<1x128xf32>
    %14 = vector.broadcast %13 : vector<1x128xf32> to vector<8x128xf32>
    %15 = arith.addf %12, %14 : vector<8x128xf32>
    %16 = arith.truncf %15 : vector<8x128xf32> to vector<8x128xbf16>
    %c0_12 = arith.constant 0 : index
    %c0_13 = arith.constant 0 : index
    %17 = vector.load %arg6[%c0_12, %c0_13] : memref<128x128xbf16, #tpu.memory_space<vmem>>, vector<128x128xbf16>
    %cst_14 = arith.constant dense<0.000000e+00> : vector<8x128xf32>
    %18 = tpu.matmul %16, %17, %cst_14 {dimension_numbers = #tpu.dot_dimension_numbers<[1], [0], [0], [1], [0, 0, 1, 1], [], []>} : vector<8x128xbf16>, vector<128x128xbf16>, vector<8x128xf32> -> vector<8x128xf32>
    %c0_15 = arith.constant 0 : index
    %c0_16 = arith.constant 0 : index
    %19 = vector.load %arg7[%c0_15, %c0_16] : memref<1x128xf32, #tpu.memory_space<vmem>>, vector<1x128xf32>
    %20 = vector.broadcast %19 : vector<1x128xf32> to vector<8x128xf32>
    %21 = arith.addf %18, %20 : vector<8x128xf32>
    %cst_17 = arith.constant 0.000000e+00 : f32
    %22 = vector.broadcast %cst_17 : f32 to vector<8x128xf32>
    %23 = arith.maximumf %21, %22 : vector<8x128xf32>
    %24 = arith.truncf %23 : vector<8x128xf32> to vector<8x128xbf16>
    %c0_18 = arith.constant 0 : index
    %c0_19 = arith.constant 0 : index
    %25 = vector.load %arg8[%c0_18, %c0_19] : memref<128x128xbf16, #tpu.memory_space<vmem>>, vector<128x128xbf16>
    %cst_20 = arith.constant dense<0.000000e+00> : vector<8x128xf32>
    %26 = tpu.matmul %24, %25, %cst_20 {dimension_numbers = #tpu.dot_dimension_numbers<[1], [0], [0], [1], [0, 0, 1, 1], [], []>} : vector<8x128xbf16>, vector<128x128xbf16>, vector<8x128xf32> -> vector<8x128xf32>
    %c0_21 = arith.constant 0 : index
    %c0_22 = arith.constant 0 : index
    %27 = vector.load %arg9[%c0_21, %c0_22] : memref<1x128xf32, #tpu.memory_space<vmem>>, vector<1x128xf32>
    %28 = vector.broadcast %27 : vector<1x128xf32> to vector<8x128xf32>
    %29 = arith.addf %26, %28 : vector<8x128xf32>
    %c0_23 = arith.constant 0 : index
    %c0_24 = arith.constant 0 : index
    %30 = vector.load %arg10[%c0_23, %c0_24] : memref<8x128xf32, #tpu.memory_space<vmem>>, vector<8x128xf32>
    tpu.vector_store %arg10[%c0_23, %c0_24], %29 {strides = array<i32>} : memref<8x128xf32, #tpu.memory_space<vmem>>, vector<8x128xf32>,
    return
  }
  func.func @transform_0(%arg0: i32) -> (i32, i32) {
    %c0_i32 = arith.constant 0 : i32
    %c0_i32_0 = arith.constant 0 : i32
    return %arg0, %c0_i32 : i32, i32
  }
  func.func @transform_1(%arg0: i32) -> (i32, i32) {
    %c0_i32 = arith.constant 0 : i32
    %c0_i32_0 = arith.constant 0 : i32
    %c0_i32_1 = arith.constant 0 : i32
    return %c0_i32, %c0_i32_0 : i32, i32
  }
  func.func @transform_2(%arg0: i32) -> (i32, i32) {
    %c0_i32 = arith.constant 0 : i32
    %c0_i32_0 = arith.constant 0 : i32
    %c0_i32_1 = arith.constant 0 : i32
    return %c0_i32, %c0_i32_0 : i32, i32
  }
  func.func @transform_3(%arg0: i32) -> (i32, i32) {
    %c0_i32 = arith.constant 0 : i32
    %c0_i32_0 = arith.constant 0 : i32
    %c0_i32_1 = arith.constant 0 : i32
    return %c0_i32, %c0_i32_0 : i32, i32
  }
  func.func @transform_4(%arg0: i32) -> (i32, i32) {
    %c0_i32 = arith.constant 0 : i32
    %c0_i32_0 = arith.constant 0 : i32
    %c0_i32_1 = arith.constant 0 : i32
    return %c0_i32, %c0_i32_0 : i32, i32
  }
  func.func @transform_5(%arg0: i32) -> (i32, i32) {
    %c0_i32 = arith.constant 0 : i32
    %c0_i32_0 = arith.constant 0 : i32
    %c0_i32_1 = arith.constant 0 : i32
    return %c0_i32, %c0_i32_0 : i32, i32
  }
  func.func @transform_6(%arg0: i32) -> (i32, i32) {
    %c0_i32 = arith.constant 0 : i32
    %c0_i32_0 = arith.constant 0 : i32
    %c0_i32_1 = arith.constant 0 : i32
    return %c0_i32, %c0_i32_0 : i32, i32
  }
  func.func @transform_7(%arg0: i32) -> (i32, i32) {
    %c0_i32 = arith.constant 0 : i32
    %c0_i32_0 = arith.constant 0 : i32
    %c0_i32_1 = arith.constant 0 : i32
    return %c0_i32, %c0_i32_0 : i32, i32
  }
  func.func @transform_8(%arg0: i32) -> (i32, i32) {
    %c0_i32 = arith.constant 0 : i32
    %c0_i32_0 = arith.constant 0 : i32
    %c0_i32_1 = arith.constant 0 : i32
    return %c0_i32, %c0_i32_0 : i32, i32
  }
  func.func @transform_9(%arg0: i32) -> (i32, i32) {
    %c0_i32 = arith.constant 0 : i32
    %c0_i32_0 = arith.constant 0 : i32
    return %arg0, %c0_i32 : i32, i32
  }
}

module attributes {stable_mosaic.version = 11 : i64} {
  func.func @deep_sets_kernel(%arg0: i32, %arg1: memref<64x16xbf16, #tpu.memory_space<vmem>>, %arg2: memref<16x128xbf16, #tpu.memory_space<vmem>>, %arg3: memref<1x128xf32, #tpu.memory_space<vmem>>, %arg4: memref<128x128xbf16, #tpu.memory_space<vmem>>, %arg5: memref<1x128xf32, #tpu.memory_space<vmem>>, %arg6: memref<128x128xbf16, #tpu.memory_space<vmem>>, %arg7: memref<1x128xf32, #tpu.memory_space<vmem>>, %arg8: memref<128x128xbf16, #tpu.memory_space<vmem>>, %arg9: memref<1x128xf32, #tpu.memory_space<vmem>>, %arg10: memref<8x128xf32, #tpu.memory_space<vmem>>) attributes {dimension_semantics = [#tpu.dimension_semantics<parallel>], iteration_bounds = array<i64: 2>, scalar_prefetch = 0 : i64, scratch_operands = 0 : i64, tpu.core_type = #tpu.core_type<tc>, window_params = [{transform_indices = @transform_0, window_bounds = array<i64: 64, 16>}, {pipeline_mode = #tpu.pipeline_mode<synchronous>, transform_indices = @transform_1, window_bounds = array<i64: 16, 128>}, {pipeline_mode = #tpu.pipeline_mode<synchronous>, transform_indices = @transform_2, window_bounds = array<i64: 1, 128>}, {pipeline_mode = #tpu.pipeline_mode<synchronous>, transform_indices = @transform_3, window_bounds = array<i64: 128, 128>}, {pipeline_mode = #tpu.pipeline_mode<synchronous>, transform_indices = @transform_4, window_bounds = array<i64: 1, 128>}, {pipeline_mode = #tpu.pipeline_mode<synchronous>, transform_indices = @transform_5, window_bounds = array<i64: 128, 128>}, {pipeline_mode = #tpu.pipeline_mode<synchronous>, transform_indices = @transform_6, window_bounds = array<i64: 1, 128>}, {pipeline_mode = #tpu.pipeline_mode<synchronous>, transform_indices = @transform_7, window_bounds = array<i64: 128, 128>}, {pipeline_mode = #tpu.pipeline_mode<synchronous>, transform_indices = @transform_8, window_bounds = array<i64: 1, 128>}, {transform_indices = @transform_9, window_bounds = array<i64: 8, 128>}]} {
    %c0 = arith.constant 0 : index
    %c0_0 = arith.constant 0 : index
    %0 = vector.load %arg1[%c0, %c0_0] : memref<64x16xbf16, #tpu.memory_space<vmem>>, vector<64x16xbf16>
    %c0_1 = arith.constant 0 : index
    %c0_2 = arith.constant 0 : index
    %1 = vector.load %arg2[%c0_1, %c0_2] : memref<16x128xbf16, #tpu.memory_space<vmem>>, vector<16x128xbf16>
    %cst = arith.constant dense<0.000000e+00> : vector<64x128xf32>
    %2 = tpu.matmul %0, %1, %cst {dimension_numbers = #tpu.dot_dimension_numbers<[1], [0], [0], [1], [0, 0, 1, 1], [], []>} : vector<64x16xbf16>, vector<16x128xbf16>, vector<64x128xf32> -> vector<64x128xf32>
    %c0_3 = arith.constant 0 : index
    %c0_4 = arith.constant 0 : index
    %3 = vector.load %arg3[%c0_3, %c0_4] : memref<1x128xf32, #tpu.memory_space<vmem>>, vector<1x128xf32>
    %4 = vector.broadcast %3 : vector<1x128xf32> to vector<64x128xf32>
    %5 = arith.addf %2, %4 : vector<64x128xf32>
    %cst_5 = arith.constant 0.000000e+00 : f32
    %6 = vector.broadcast %cst_5 : f32 to vector<64x128xf32>
    %7 = arith.maximumf %5, %6 : vector<64x128xf32>
    %8 = vector.shape_cast %7 : vector<64x128xf32> to vector<8x8x128xf32>
    %cst_6 = arith.constant dense<0.000000e+00> : vector<8x128xf32>
    %9 = vector.multi_reduction <add>, %8, %cst_6 [1] : vector<8x8x128xf32> to vector<8x128xf32>
    %10 = arith.truncf %9 : vector<8x128xf32> to vector<8x128xbf16>
    %c0_7 = arith.constant 0 : index
    %c0_8 = arith.constant 0 : index
    %11 = vector.load %arg4[%c0_7, %c0_8] : memref<128x128xbf16, #tpu.memory_space<vmem>>, vector<128x128xbf16>
    %cst_9 = arith.constant dense<0.000000e+00> : vector<8x128xf32>
    %12 = tpu.matmul %10, %11, %cst_9 {dimension_numbers = #tpu.dot_dimension_numbers<[1], [0], [0], [1], [0, 0, 1, 1], [], []>} : vector<8x128xbf16>, vector<128x128xbf16>, vector<8x128xf32> -> vector<8x128xf32>
    %c0_10 = arith.constant 0 : index
    %c0_11 = arith.constant 0 : index
    %13 = vector.load %arg5[%c0_10, %c0_11] : memref<1x128xf32, #tpu.memory_space<vmem>>, vector<1x128xf32>
    %14 = vector.broadcast %13 : vector<1x128xf32> to vector<8x128xf32>
    %15 = arith.addf %12, %14 : vector<8x128xf32>
    %16 = arith.truncf %15 : vector<8x128xf32> to vector<8x128xbf16>
    %c0_12 = arith.constant 0 : index
    %c0_13 = arith.constant 0 : index
    %17 = vector.load %arg6[%c0_12, %c0_13] : memref<128x128xbf16, #tpu.memory_space<vmem>>, vector<128x128xbf16>
    %cst_14 = arith.constant dense<0.000000e+00> : vector<8x128xf32>
    %18 = tpu.matmul %16, %17, %cst_14 {dimension_numbers = #tpu.dot_dimension_numbers<[1], [0], [0], [1], [0, 0, 1, 1], [], []>} : vector<8x128xbf16>, vector<128x128xbf16>, vector<8x128xf32> -> vector<8x128xf32>
    %c0_15 = arith.constant 0 : index
    %c0_16 = arith.constant 0 : index
    %19 = vector.load %arg7[%c0_15, %c0_16] : memref<1x128xf32, #tpu.memory_space<vmem>>, vector<1x128xf32>
    %20 = vector.broadcast %19 : vector<1x128xf32> to vector<8x128xf32>
    %21 = arith.addf %18, %20 : vector<8x128xf32>
    %cst_17 = arith.constant 0.000000e+00 : f32
    %22 = vector.broadcast %cst_17 : f32 to vector<8x128xf32>
    %23 = arith.maximumf %21, %22 : vector<8x128xf32>
    %24 = arith.truncf %23 : vector<8x128xf32> to vector<8x128xbf16>
    %c0_18 = arith.constant 0 : index
    %c0_19 = arith.constant 0 : index
    %25 = vector.load %arg8[%c0_18, %c0_19] : memref<128x128xbf16, #tpu.memory_space<vmem>>, vector<128x128xbf16>
    %cst_20 = arith.constant dense<0.000000e+00> : vector<8x128xf32>
    %26 = tpu.matmul %24, %25, %cst_20 {dimension_numbers = #tpu.dot_dimension_numbers<[1], [0], [0], [1], [0, 0, 1, 1], [], []>} : vector<8x128xbf16>, vector<128x128xbf16>, vector<8x128xf32> -> vector<8x128xf32>
    %c0_21 = arith.constant 0 : index
    %c0_22 = arith.constant 0 : index
    %27 = vector.load %arg9[%c0_21, %c0_22] : memref<1x128xf32, #tpu.memory_space<vmem>>, vector<1x128xf32>
    %28 = vector.broadcast %27 : vector<1x128xf32> to vector<8x128xf32>
    %29 = arith.addf %26, %28 : vector<8x128xf32>
    %c0_23 = arith.constant 0 : index
    %c0_24 = arith.constant 0 : index
    %30 = vector.load %arg10[%c0_23, %c0_24] : memref<8x128xf32, #tpu.memory_space<vmem>>, vector<8x128xf32>
    tpu.vector_store %arg10[%c0_23, %c0_24], %29 {strides = array<i32>} : memref<8x128xf32, #tpu.memory_space<vmem>>, vector<8x128xf32>,
    return
  }
  func.func @transform_0(%arg0: i32) -> (i32, i32) {
    %c0_i32 = arith.constant 0 : i32
    %c0_i32_0 = arith.constant 0 : i32
    return %arg0, %c0_i32 : i32, i32
  }
  func.func @transform_1(%arg0: i32) -> (i32, i32) {
    %c0_i32 = arith.constant 0 : i32
    %c0_i32_0 = arith.constant 0 : i32
    %c0_i32_1 = arith.constant 0 : i32
    return %c0_i32, %c0_i32_0 : i32, i32
  }
  func.func @transform_2(%arg0: i32) -> (i32, i32) {
    %c0_i32 = arith.constant 0 : i32
    %c0_i32_0 = arith.constant 0 : i32
    %c0_i32_1 = arith.constant 0 : i32
    return %c0_i32, %c0_i32_0 : i32, i32
  }
  func.func @transform_3(%arg0: i32) -> (i32, i32) {
    %c0_i32 = arith.constant 0 : i32
    %c0_i32_0 = arith.constant 0 : i32
    %c0_i32_1 = arith.constant 0 : i32
    return %c0_i32, %c0_i32_0 : i32, i32
  }
  func.func @transform_4(%arg0: i32) -> (i32, i32) {
    %c0_i32 = arith.constant 0 : i32
    %c0_i32_0 = arith.constant 0 : i32
    %c0_i32_1 = arith.constant 0 : i32
    return %c0_i32, %c0_i32_0 : i32, i32
  }
  func.func @transform_5(%arg0: i32) -> (i32, i32) {
    %c0_i32 = arith.constant 0 : i32
    %c0_i32_0 = arith.constant 0 : i32
    %c0_i32_1 = arith.constant 0 : i32
    return %c0_i32, %c0_i32_0 : i32, i32
  }
  func.func @transform_6(%arg0: i32) -> (i32, i32) {
    %c0_i32 = arith.constant 0 : i32
    %c0_i32_0 = arith.constant 0 : i32
    %c0_i32_1 = arith.constant 0 : i32
    return %c0_i32, %c0_i32_0 : i32, i32
  }
  func.func @transform_7(%arg0: i32) -> (i32, i32) {
    %c0_i32 = arith.constant 0 : i32
    %c0_i32_0 = arith.constant 0 : i32
    %c0_i32_1 = arith.constant 0 : i32
    return %c0_i32, %c0_i32_0 : i32, i32
  }
  func.func @transform_8(%arg0: i32) -> (i32, i32) {
    %c0_i32 = arith.constant 0 : i32
    %c0_i32_0 = arith.constant 0 : i32
    %c0_i32_1 = arith.constant 0 : i32
    return %c0_i32, %c0_i32_0 : i32, i32
  }
  func.func @transform_9(%arg0: i32) -> (i32, i32) {
    %c0_i32 = arith.constant 0 : i32
    %c0_i32_0 = arith.constant 0 : i32
    return %arg0, %c0_i32 : i32, i32
  }
}

</mosaic_0001>

<bundles_post_ra>
// kernel: tpu_custom_call.1
= control target key start
LH: loop header
LB: loop body
LE: loop exit
PB: predicated region body
PF: predicated region fallthrough
CT: control target
= control target key end

     0   :  { %14 = vsyncpa [#allocation3], 0  ;;  %s1647_s0 = inlined_call_operand.vmem [shape: bf16[128,16], index: 0, kind: input, shape index: {}]   ;;  %s1648_s1 = inlined_call_operand.vmem [shape: bf16[16,128], index: 1, kind: input, shape index: {}]   ;;  %s1649_s2 = inlined_call_operand.vmem [shape: f32[1,128], index: 2, kind: input, shape index: {}]   ;;  %s1650_s3 = inlined_call_operand.vmem [shape: bf16[128,128], index: 3, kind: input, shape index: {}]   ;;  %s1651_s4 = inlined_call_operand.vmem [shape: f32[1,128], index: 4, kind: input, shape index: {}]   ;;  %s1652_s5 = inlined_call_operand.hbm [shape: bf16[128,128], index: 5, kind: input, shape index: {}]   ;;  %s1653_s6 = inlined_call_operand.vmem [shape: f32[1,128], index: 6, kind: input, shape index: {}]   ;;  %s1654_s7 = inlined_call_operand.hbm [shape: bf16[128,128], index: 7, kind: input, shape index: {}]   ;;  %s1655_s8 = inlined_call_operand.vmem [shape: f32[1,128], index: 8, kind: input, shape index: {}]   ;;  %s1656_s9 = inlined_call_operand.hbm [shape: f32[16,128], index: 9, kind: output, shape index: {}]  }
   0x1   :  { %15 = vsyncpa [#allocation6], 0 }
   0x2   :  { %16 = vsyncpa [#allocation4], 0 }
   0x3   :  { %18 = vsyncpa [#allocation4 + $0x1], 0  ;;  %s1439_s30 = smov 0   ;;  %s1441_s10 = smov 0  }
   0x4   :  { %s1443_s11 = smov 0   ;;  %s1445_s12 = smov 0  }
   0x5 LB: > { %s1460_s13 = sadd.s32 4294967295, %s1380_s12   ;;  %s1013_s14 = sadd.s32 4294967294, %s1380_s12   ;;  %s1380_s12 = sphi %s1445_s12, %s1670_s12   ;;  %s1376_s11 = sphi %s1443_s11, %s1669_s11   ;;  %s1372_s10 = sphi %s1441_s10, %s1668_s10   ;;  %s1368_s30 = sphi %s1439_s30, %s1667_s30  }
   0x6   : > { %s1464_s15 = sadd.s32 1, %s1380_s12   ;;  %s225_s16 = sadd.s32 1, %s1376_s11 }
   0x7   : > { %s222_s17 = ssub.s32 %s1380_s12, %s1464_s15  ;;  %p235_p0 = scmp.ne.s32.totalorder %s1376_s11, %s1372_s10 }
   0x8   : > { %p223_p1 = scmp.eq.s32.totalorder %s222_s17, 0  ;;  %p236_p2 = scmp.eq.s32.totalorder %s1460_s13, 1 }
   0x9   : > { %p241_p3 = scmp.ne.s32.totalorder %s1372_s10, %s1368_s30  ;;  %p242_p4 = scmp.eq.s32.totalorder %s1013_s14, 1 }
   0xa   : > { %s1475_s18 = scalar_select %p223_p1, %s1376_s11, %s225_s16  }
   0xb   : > { %p1477_p5 = por %p236_p2, %p235_p0  ;;  %p1481_p6 = por %p242_p4, %p241_p3 }
   0xc   : > { %p1014_p7 = scmp.ge.s32.totalorder %s1380_s12, 1  ;;  %p249_p8 = scmp.lt.s32.totalorder %s1380_s12, 3 }
   0xd   : > { %s1659_s20 = scalar_select %p1481_p6, 1, 0 }
   0xe   : > { %p1657_p9 = scmp.eq.s32.totalorder %s1460_s13, 0  ;;  %p1488_p10 = pnand %p1014_p7, %p249_p8 }
   0xf   : > { %s1382_s22 = smov [#allocation2]   ;;  %s1383_s25 = smov [#allocation5]  }
  0x10   : > { %s273_s23 = sshll.u32 %s1382_s22, 4  ;;  %p1177_p11 = pneg %p1488_p10  ;;  %s274_s23 = int_to_ptr.vmem [resolvable:$true] %s273_s23 }
  0x11   : > { %s289_s26 = sshll.u32 %s1383_s25, 4  ;;  %s1271_s27 = scalar_lea.vmem %s274_s23, 1024  ;;  %s290_s26 = int_to_ptr.vmem [resolvable:$true] %s289_s26 }
  0x12   : > { %p1496_p12 = pnand %p1657_p9, %p1177_p11  ;;  %p1272_p0 = scmp.ne.s32.totalorder %s274_s23, %s1271_s27 }
  0x13   : > { %p1279_p3 = scmp.lt.s32.totalorder %s274_s23, %s274_s23  ;;  %p1280_p4 = scmp.lt.s32.totalorder %s1271_s27, %s1271_s27 }
  0x14   : > { %p1262_p13 = pneg %p1496_p12 }
  0x15   : > { %p1281_p7 = por %p1280_p4, %p1279_p3 }
  0x16   : > { %p1274_p1 = pnand %p1272_p0, %p1262_p13 }
  0x18   : > { %p1275_p2 = pneg %p1274_p1 }
  0x1a   : > { %p1282_p8 = pnand %p1281_p7, %p1275_p2 }
  0x1c   : > { %1285 = shalt.err (!%p1282_p8)
}
  0x1d   : > { %s1384_s28 = smov 64   ;;  %s1385_s29 = smov 4  }
  0x1e   : > { %1180 = dma.hbm_to_vmem [thread:$0]  (!%p1496_p12), %s1652_s5, 1024, %s274_s23, [#allocation3], %s1384_s28, %s1384_s28, %s1385_s29  }
  0x1f   : > { %s1297_s17 = scalar_lea.vmem %s290_s26, 1024  ;;  %p1305_p9 = scmp.lt.s32.totalorder %s290_s26, %s290_s26 }
  0x20   : > { %p1298_p11 = scmp.ne.s32.totalorder %s290_s26, %s1297_s17  ;;  %p1306_p6 = scmp.lt.s32.totalorder %s1297_s17, %s1297_s17 }
  0x22   : > { %p1300_p0 = pnand %p1298_p11, %p1262_p13  ;;  %p1307_p3 = por %p1306_p6, %p1305_p9 }
  0x24   : > { %p1301_p1 = pneg %p1300_p0 }
  0x26   : > { %p1308_p2 = pnand %p1307_p3, %p1301_p1 }
  0x28   : > { %1311 = shalt.err (!%p1308_p2)
}
  0x29   : > { %1183 = dma.hbm_to_vmem [thread:$0]  (!%p1496_p12), %s1654_s7, 1024, %s290_s26, [#allocation6], %s1384_s28, %s1384_s28, %s1385_s29  }
  0x2a   : > { %317 = sbr.rel (%p1488_p10) target bundleno = 897 (0x381), region = 56  ;;  %p1662_p4 = scmp.eq.s32.totalorder (!%p1488_p10), %s1460_s13, 0 }
  0x2f   : > { %1355 = dma.done.wait (%p1662_p4), [#allocation3], 1024   ;;  %p1663_p13 = pmov %p1662_p4 }
  0x30   : > { %p1664_p7 = pmov %p1662_p4 }
  0x31   : > { %1357 = vsyncadd (%p1663_p13), [#allocation3], 4294966272 }
  0x32   : > { %1359 = dma.done.wait (%p1664_p7), [#allocation6], 1024   ;;  %p1665_p6 = pmov %p1662_p4 }
  0x33   : > { %s1022_s23 = sshll.u32 %s1460_s13, 3  ;;  %v1231_v0 = vld [vmem:[%s1648_s1] sm:$0xff]   ;;  %vm407_vm0 = vcmask 130048   ;;  %v1236_v5 = vld [vmem:[%s1650_s3 + $0x38] sm:$0xff]   ;;  %v1386_v6 = vmov 0.0   ;;  %v1237_v7 = vld [vmem:[%s1650_s3 + $0x30] sm:$0xff]  }
  0x34   : > { %1361 = vsyncadd (%p1665_p6), [#allocation6], 4294966272  ;;  %p358_p9 = scmp.lt.s32.totalorder %s1022_s23, 15  ;;  %1097 = vmatprep.subr.bf16.mxu0 %v1231_v0  ;;  %1107 = vmatprep.subr.bf16.mxu1 %v1386_v6  ;;  %v1238_v8 = vld [vmem:[%s1650_s3 + $0x28] sm:$0xff]   ;;  %v1239_v9 = vld [vmem:[%s1650_s3 + $0x20] sm:$0xff]   ;;  %vm1387_vm1 = vmmov 0  }
  0x35   : > { %1098 = vmatpush3.bf16.msra.mxu0 %v1231_v0  ;;  %1108 = vmatpush3.bf16.msra.mxu1 %v1236_v5  ;;  %v1240_v10 = vld [vmem:[%s1650_s3 + $0x18] sm:$0xff]   ;;  %v1241_v11 = vld [vmem:[%s1650_s3 + $0x10] sm:$0xff]   ;;  %v1242_v12 = vld [vmem:[%s1650_s3 + $0x8] sm:$0xff]   ;;  %vm588_vm2 = vcmask 1041409   ;;  %vm590_vm3 = vcmask 1042434   ;;  %vm592_vm4 = vcmask 1043459  }
  0x36   : > { %s1672_s23 = smov (!%p358_p9, %s1022_s23), 15  ;;  %1127 = vmatprep.subr.bf16.mxu0 %v1386_v6  ;;  %1109 = vmatprep.subr.bf16.mxu1 %v1386_v6  ;;  %v1243_v13 = vld [vmem:[%s1650_s3] sm:$0xff]   ;;  %v1244_v14 = vld [vmem:[#allocation2 + $0x38] sm:$0xff]   ;;  %v1245_v15 = vld [vmem:[#allocation2 + $0x30] sm:$0xff]   ;;  %vm594_vm5 = vcmask 1044484   ;;  %vm596_vm6 = vcmask 1045509  }
  0x37   : > { %s1023_s24 = sshll.u32 %s1672_s23, 2  ;;  %1123 = vmatprep.mubr.msk.bf16.mxu1 %vm1387_vm1, %v1386_v6  ;;  %v1246_v16 = vld [vmem:[#allocation2 + $0x28] sm:$0xff]   ;;  %v1247_v17 = vld [vmem:[#allocation2 + $0x20] sm:$0xff]   ;;  %v1248_v18 = vld [vmem:[#allocation2 + $0x18] sm:$0xff]   ;;  %vm598_vm7 = vcmask 1046534   ;;  %vm600_vm8 = vcmask 1047559  }
  0x38   : > { %s361_s27 = scalar_lea.vmem %s1647_s0, %s1023_s24  ;;  %v1249_v19 = vld [vmem:[#allocation2 + $0x10] sm:$0xff]   ;;  %v1250_v20 = vld [vmem:[#allocation2 + $0x8] sm:$0xff]   ;;  %v1024_v21 = vld [vmem:[%s1649_s2] ss:$0 sm:$0xff]  ;;  %s354_s28 = sand.u32 1, %s1372_s10  }
  0x39   : > { %v1232_v1 = vld [vmem:[%s361_s27] sm:$0xff]   ;;  %v1233_v2 = vld [vmem:[%s361_s27 + $0x8] sm:$0xff]   ;;  %v1234_v3 = vld [vmem:[%s361_s27 + $0x10] sm:$0xff]   ;;  %1110 = vmatpush3.bf16.msra.mxu1 %v1237_v7  ;;  %s1021_s29 = sshll.u32 %s354_s28, 3  ;;  %s1062_s17 = sshll.u32 %s1460_s13, 7 }
  0x3a   : > { %1099 = vmatprep.mubr.msk.bf16.mxu0 %vm407_vm0, %v1232_v1  ;;  %v1235_v4 = vld [vmem:[%s361_s27 + $0x18] sm:$0xff]   ;;  %1111 = vmatprep.subr.bf16.mxu1 %v1386_v6  ;;  %s356_s22 = scalar_lea.vmem [#allocation7], %s1021_s29  ;;  %s1606_s26 = scalar_lea.hbm %s1656_s9, %s1062_s17 }
  0x3b   : > { %1100 = vmatmul.mubr.msk.bf16.vlgmr.msra.gmra.mxu0 %vm407_vm0, %v1233_v2  ;;  %s932_s25 = sshll.u32 %s356_s22, 4  ;;  %s919_s21 = scalar_lea.sflag [#allocation4], %s354_s28  ;;  %s1608_s25 = int_to_ptr.vmem [resolvable:$true] %s932_s25 }
  0x3c   : > { %1103 = vmatprep.mubr.msk.bf16.mxu0 %vm407_vm0, %v1234_v3  ;;  %1128 = vmatpush3.bf16.msra.mxu0 %v1244_v14  ;;  %s1312_s27 = scalar_lea.vmem %s1608_s25, 128  ;;  %s1388_s13 = smov [#allocation7]  }
  0x3d   : > { %1112 = vmatpush3.bf16.msra.mxu1 %v1238_v8  ;;  %1129 = vmatprep.subr.bf16.mxu0 %v1386_v6  ;;  %p1313_p10 = scmp.ne.s32.totalorder %s1608_s25, %s1312_s27  ;;  %s1316_s29 = sshll.u32 %s1388_s13, 4  ;;  %s1317_s29 = int_to_ptr.vmem [resolvable:$false] %s1316_s29 }
  0x3e   : > { %1113 = vmatprep.subr.bf16.mxu1 %v1386_v6  ;;  %s1318_s14 = scalar_lea.vmem %s1317_s29, 256  ;;  %p1319_p11 = scmp.lt.s32.totalorder %s1608_s25, %s1317_s29 }
  0x3f   : > { %p1314_p12 = pnand %p1313_p10, %p1477_p5  ;;  %p1320_p0 = scmp.lt.s32.totalorder %s1318_s14, %s1312_s27 }
  0x40   : > { %1130 = vmatpush3.bf16.msra.mxu0 %v1245_v15 }
  0x41   : > { %1114 = vmatpush3.bf16.msra.mxu1 %v1239_v9  ;;  %1131 = vmatprep.subr.bf16.mxu0 %v1386_v6  ;;  %p1315_p8 = pneg %p1314_p12  ;;  %p1321_p1 = por %p1320_p0, %p1319_p11 }
  0x42   : > { %1115 = vmatprep.subr.bf16.mxu1 %v1386_v6 }
  0x43   : > { %1104 = vmatmul.mubr.msk.bf16.gmra.mxu0 %vm407_vm0, %v1235_v4  ;;  %p1322_p3 = pnand %p1321_p1, %p1315_p8 }
  0x44   : > { %1143 = vmatprep.mubr.msk.bf16.mxu0 %vm1387_vm1, %v1386_v6  ;;  %1132 = vmatpush3.bf16.msra.mxu0 %v1246_v16 }
  0x45   : > { %1116 = vmatpush3.bf16.msra.mxu1 %v1240_v10  ;;  %1133 = vmatprep.subr.bf16.mxu0 %v1386_v6 }
  0x46   : > { %1117 = vmatprep.subr.bf16.mxu1 %v1386_v6 }
  0x48   : > { %1134 = vmatpush3.bf16.msra.mxu0 %v1247_v17 }
  0x49   : > { %1118 = vmatpush3.bf16.msra.mxu1 %v1241_v11  ;;  %1135 = vmatprep.subr.bf16.mxu0 %v1386_v6 }
  0x4a   : > { %1119 = vmatprep.subr.bf16.mxu1 %v1386_v6 }
  0x4c   : > { %1136 = vmatpush3.bf16.msra.mxu0 %v1248_v18 }
  0x4d   : > { %1120 = vmatpush3.bf16.msra.mxu1 %v1242_v12  ;;  %1137 = vmatprep.subr.bf16.mxu0 %v1386_v6 }
  0x4e   : > { %1121 = vmatprep.subr.bf16.mxu1 %v1386_v6 }
  0x50   : > { %1138 = vmatpush3.bf16.msra.mxu0 %v1249_v19 }
  0x51   : > { %1122 = vmatpush3.bf16.msra.mxu1 %v1243_v13  ;;  %1139 = vmatprep.subr.bf16.mxu0 %v1386_v6 }
  0x52   : > { %1147 = vmatprep.subr.bf16.mxu1 %v1386_v6 }
  0x54   : > { %1140 = vmatpush3.bf16.msra.mxu0 %v1250_v20 }
  0x55   : > { %1141 = vmatprep.subr.bf16.mxu0 %v1386_v6 }
  0xfb   : > { %v1101_v22 = vpop.f32.mrf.mxu0 }
  0xfc   : > { %v463_v23 = vadd.f32 %v1101_v22, %v1024_v21 }
  0xfd   : > { %v454_v24 = vpop.f32.mrf.mxu0 }
  0xfe   : > { %v487_v25 = vmax.f32 %v463_v23, 0.0  ;;  %v455_v26 = vadd.f32 %v1024_v21, %v454_v24 }
  0xff   : > { %v1102_v27 = vpop.f32.mrf.mxu0 }
 0x100   : > { %v505_v28 = vrot.slane %v487_v25, 4  ;;  %v485_v29 = vmax.f32 %v455_v26, 0.0  ;;  %v466_v30 = vadd.f32 %v1102_v27, %v1024_v21 }
 0x101   : > { %v457_v31 = vpop.f32.mrf.mxu0 }
 0x102   : > { %v506_v32 = vadd.f32 %v505_v28, %v487_v25  ;;  %v493_v33 = vrot.slane %v485_v29, 4  ;;  %v488_v34 = vmax.f32 %v466_v30, 0.0  ;;  %v458_v35 = vadd.f32 %v1024_v21, %v457_v31 }
 0x103   : > { %v1105_v36 = vpop.f32.mrf.mxu0 }
 0x104   : > { %v507_v37 = vrot.slane %v506_v32, 2  ;;  %v494_v38 = vadd.f32 %v493_v33, %v485_v29  ;;  %v511_v39 = vrot.slane %v488_v34, 4  ;;  %v486_v40 = vmax.f32 %v458_v35, 0.0 }
 0x105   : > { %v479_v41 = vadd.f32 %v1105_v36, %v1024_v21  ;;  %v470_v42 = vpop.f32.mrf.mxu0 }
 0x106   : > { %v508_v43 = vadd.f32 %v507_v37, %v506_v32  ;;  %v495_v44 = vrot.slane %v494_v38, 2  ;;  %v512_v45 = vadd.f32 %v511_v39, %v488_v34  ;;  %v499_v46 = vrot.slane %v486_v40, 4 }
 0x107   : > { %v491_v47 = vmax.f32 %v479_v41, 0.0  ;;  %v471_v48 = vadd.f32 %v1024_v21, %v470_v42  ;;  %v1106_v49 = vpop.f32.mrf.mxu0 }
 0x108   : > { %v496_v50 = vadd.f32 %v495_v44, %v494_v38  ;;  %v513_v51 = vrot.slane %v512_v45, 2  ;;  %v500_v52 = vadd.f32 %v499_v46, %v486_v40  ;;  %v482_v55 = vadd.f32 %v1106_v49, %v1024_v21 }
 0x109   : > { %v529_v53 = vrot.slane %v491_v47, 4  ;;  %v489_v54 = vmax.f32 %v471_v48, 0.0  ;;  %v473_v56 = vpop.f32.mrf.mxu0  ;;  %v509_v57 = vrot.slane %v508_v43, 1 }
 0x10a   : > { %v497_v58 = vrot.slane %v496_v50, 1  ;;  %v514_v59 = vadd.f32 %v513_v51, %v512_v45  ;;  %v501_v60 = vrot.slane %v500_v52, 2  ;;  %v492_v63 = vmax.f32 %v482_v55, 0.0  ;;  %v1251_v55 = vld [vmem:[#allocation2] sm:$0xff]  }
 0x10b   : > { %v530_v61 = vadd.f32 %v529_v53, %v491_v47  ;;  %v517_v62 = vrot.slane %v489_v54, 4  ;;  %v474_v0 = vadd.f32 %v1024_v21, %v473_v56  ;;  %v510_v8 = vadd.f32 %v509_v57, %v508_v43  ;;  %1142 = vmatpush3.bf16.msra.mxu0 %v1251_v55  ;;  %v1252_v56 = vld [vmem:[#allocation5 + $0x38] sm:$0xff]   ;;  %v1253_v57 = vld [vmem:[#allocation5 + $0x30] sm:$0xff]  }
 0x10c   : > { %v498_v1 = vadd.f32 %v497_v58, %v496_v50  ;;  %v502_v2 = vadd.f32 %v501_v60, %v500_v52  ;;  %v535_v5 = vrot.slane %v492_v63, 4  ;;  %v515_v9 = vrot.slane %v514_v59, 1  ;;  %v1254_v58 = vld [vmem:[#allocation5 + $0x28] sm:$0xff]   ;;  %v1256_v60 = vld [vmem:[#allocation5 + $0x18] sm:$0xff]  }
 0x10d   : > { %v531_v3 = vrot.slane %v530_v61, 2  ;;  %v518_v4 = vadd.f32 %v517_v62, %v489_v54  ;;  %v490_v7 = vmax.f32 %v474_v0, 0.0  ;;  %v543_v20 = vpack.c.bf16 %v510_v8, %v510_v8  ;;  %v1034_v62 = vld [vmem:[%s1651_s4] ss:$0 sm:$0xff] }
 0x10e   : > { %v503_v10 = vrot.slane %v502_v2, 1  ;;  %v536_v13 = vadd.f32 %v535_v5, %v492_v63  ;;  %v541_v15 = vpack.c.bf16 %v498_v1, %v498_v1  ;;  %v516_v21 = vadd.f32 %v515_v9, %v514_v59  ;;  %v1255_v59 = vld [vmem:[#allocation5 + $0x20] sm:$0xff]   ;;  %v1258_v5 = vld [vmem:[#allocation5 + $0x8] sm:$0xff]  }
 0x10f   : > { %v532_v11 = vadd.f32 %v531_v3, %v530_v61  ;;  %v519_v12 = vrot.slane %v518_v4, 2  ;;  %v523_v14 = vrot.slane %v490_v7, 4  ;;  %v582_v34 = vunpack.c.l.b16 %v543_v20  ;;  %v1257_v61 = vld [vmem:[#allocation5 + $0x10] sm:$0xff]   ;;  %v1043_v8 = vld [vmem:[%s1653_s6] ss:$0 sm:$0xff] }
 0x110   : > { %v504_v16 = vadd.f32 %v503_v10, %v502_v2  ;;  %v537_v18 = vrot.slane %v536_v13, 2  ;;  %v580_v27 = vunpack.c.l.b16 %v541_v15  ;;  %v544_v32 = vpack.c.bf16 %v516_v21, %v516_v21 }
 0x111   : > { %v520_v17 = vadd.f32 %v519_v12, %v518_v4  ;;  %v524_v19 = vadd.f32 %v523_v14, %v490_v7  ;;  %v533_v23 = vrot.slane %v532_v11, 1  ;;  %v1259_v7 = vld [vmem:[#allocation5] sm:$0xff]  }
 0x112   : > { %v542_v22 = vpack.c.bf16 %v504_v16, %v504_v16  ;;  %v538_v25 = vadd.f32 %v537_v18, %v536_v13  ;;  %v583_v40 = vunpack.c.l.b16 %v544_v32 }
 0x113   : > { %v521_v24 = vrot.slane %v520_v17, 1  ;;  %v525_v26 = vrot.slane %v524_v19, 2  ;;  %v534_v35 = vadd.f32 %v533_v23, %v532_v11 }
 0x114   : > { %v581_v28 = vunpack.c.l.b16 %v542_v22  ;;  %v539_v30 = vrot.slane %v538_v25, 1 }
 0x115   : > { %v522_v29 = vadd.f32 %v521_v24, %v520_v17  ;;  %v526_v31 = vadd.f32 %v525_v26, %v524_v19  ;;  %v547_v42 = vpack.c.bf16 %v534_v35, %v534_v35 }
 0x116   : > { %v589_v33 = vsel %vm588_vm2, %v581_v28, %v580_v27  ;;  %v540_v37 = vadd.f32 %v539_v30, %v538_v25 }
 0x117   : > { %v545_v36 = vpack.c.bf16 %v522_v29, %v522_v29  ;;  %v527_v38 = vrot.slane %v526_v31, 1  ;;  %v591_v39 = vsel %vm590_vm3, %v582_v34, %v589_v33  ;;  %v586_v48 = vunpack.c.l.b16 %v547_v42 }
 0x118   : > { %v548_v44 = vpack.c.bf16 %v540_v37, %v540_v37  ;;  %v593_v46 = vsel %vm592_vm4, %v583_v40, %v591_v39 }
 0x119   : > { %v528_v41 = vadd.f32 %v527_v38, %v526_v31  ;;  %v584_v43 = vunpack.c.l.b16 %v545_v36 }
 0x11a   : > { %v587_v50 = vunpack.c.l.b16 %v548_v44 }
 0x11b   : > { %v546_v45 = vpack.c.bf16 %v528_v41, %v528_v41  ;;  %v595_v49 = vsel %vm594_vm5, %v584_v43, %v593_v46 }
 0x11d   : > { %v585_v47 = vunpack.c.l.b16 %v546_v45 }
 0x11f   : > { %v597_v51 = vsel %vm596_vm6, %v585_v47, %v595_v49 }
 0x120   : > { %v599_v52 = vsel %vm598_vm7, %v586_v48, %v597_v51 }
 0x121   : > { %v601_v53 = vsel %vm600_vm8, %v587_v50, %v599_v52 }
 0x122   : > { %v602_v54 = vpack.c.b16 %v601_v53, %v601_v53 }
 0x124   : > { %1124 = vmatmul.mubr.bf16.vlgmr.msra.gmra.mxu1 %v602_v54 }
 0x125   : > { %1163 = vmatprep.mubr.msk.bf16.mxu1 %vm1387_vm1, %v1386_v6  ;;  %1148 = vmatpush3.bf16.msra.mxu1 %v1252_v56 }
 0x126   : > { %1149 = vmatprep.subr.bf16.mxu1 %v1386_v6 }
 0x129   : > { %1150 = vmatpush3.bf16.msra.mxu1 %v1253_v57 }
 0x12a   : > { %1151 = vmatprep.subr.bf16.mxu1 %v1386_v6 }
 0x12d   : > { %1152 = vmatpush3.bf16.msra.mxu1 %v1254_v58 }
 0x12e   : > { %1153 = vmatprep.subr.bf16.mxu1 %v1386_v6 }
 0x131   : > { %1154 = vmatpush3.bf16.msra.mxu1 %v1255_v59 }
 0x132   : > { %1155 = vmatprep.subr.bf16.mxu1 %v1386_v6 }
 0x135   : > { %1156 = vmatpush3.bf16.msra.mxu1 %v1256_v60 }
 0x136   : > { %1157 = vmatprep.subr.bf16.mxu1 %v1386_v6 }
 0x139   : > { %1158 = vmatpush3.bf16.msra.mxu1 %v1257_v61 }
 0x13a   : > { %1159 = vmatprep.subr.bf16.mxu1 %v1386_v6 }
 0x13d   : > { %1160 = vmatpush3.bf16.msra.mxu1 %v1258_v5 }
 0x13e   : > { %1161 = vmatprep.subr.bf16.mxu1 %v1386_v6  ;;  %v1052_v6 = vld [vmem:[%s1655_s8] ss:$0 sm:$0xff] }
 0x141   : > { %1162 = vmatpush3.bf16.msra.mxu1 %v1259_v7 }
 0x1e4   : > { %v686_v63 = vpop.f32.mrf.mxu1 }
 0x1e5   : > { %v687_v0 = vadd.f32 %v1034_v62, %v686_v63 }
 0x1e6   : > { %v1125_v1 = vpop.f32.mrf.mxu1 }
 0x1e7   : > { %v692_v2 = vpack.c.bf16 %v687_v0, %v687_v0 }
 0x1e8   : > { %v689_v3 = vpop.f32.mrf.mxu1 }
 0x1e9   : > { %1144 = vmatmul.mubr.bf16.vlgmr.msra.gmra.mxu0 %v692_v2 }
 0x1ea   : > { %v1126_v4 = vpop.f32.mrf.mxu1 }
 0x2a9   : > { %v798_v9 = vpop.f32.mrf.mxu0 }
 0x2aa   : > { %v799_v10 = vadd.f32 %v1043_v8, %v798_v9 }
 0x2ab   : > { %v1145_v11 = vpop.f32.mrf.mxu0 }
 0x2ac   : > { %v804_v12 = vmax.f32 %v799_v10, 0.0 }
 0x2ad   : > { %v801_v13 = vpop.f32.mrf.mxu0 }
 0x2ae   : > { %v805_v14 = vpack.c.bf16 %v804_v12, %v804_v12 }
 0x2af   : > { %v1146_v15 = vpop.f32.mrf.mxu0 }
 0x2b0   : > { %1164 = vmatmul.mubr.bf16.vlgmr.msra.gmra.mxu1 %v805_v14 }
 0x370   : > { %v911_v16 = vpop.f32.mrf.mxu1 }
 0x371   : > { %v912_v17 = vadd.f32 %v1052_v6, %v911_v16 }
 0x372   : > { %v1165_v18 = vpop.f32.mrf.mxu1 }
 0x373   : > { %917 = vst [vmem:[%s356_s22] sm:$0xff] %v912_v17 }
 0x374   : > { %v914_v19 = vpop.f32.mrf.mxu1 }
 0x375   : > { %1325 = shalt.err (!%p1322_p3)
}
 0x376   : > { %s1326_s16 = scalar_lea.hbm %s1606_s26, 128  ;;  %s1330_s22 = scalar_lea.hbm %s1656_s9, 256 }
 0x377   : > { %p1327_p2 = scmp.ne.s32.totalorder %s1606_s26, %s1326_s16  ;;  %p1331_p7 = scmp.lt.s32.totalorder %s1606_s26, %s1656_s9 }
 0x378   : > { %p1332_p6 = scmp.lt.s32.totalorder %s1330_s22, %s1326_s16 }
 0x379   : > { %p1328_p4 = pnand %p1327_p2, %p1477_p5 }
 0x37a   : > { %p1333_p9 = por %p1332_p6, %p1331_p7 }
 0x37b   : > { %p1329_p13 = pneg %p1328_p4 }
 0x37d   : > { %p1334_p10 = pnand %p1333_p9, %p1329_p13 }
 0x37f   : > { %1337 = shalt.err (!%p1334_p10)
}
 0x380   : > { %1175 = dma.vmem_to_hbm [thread:$0]  (%p1477_p5), %s1608_s25, 128, %s1606_s26, %s919_s21   ;;  %v1166_v20 = vpop.f32.mrf.mxu1 }
 0x381 PF: > { %p1192_p12 = scmp.ge.s32.totalorder %s1380_s12, 2  ;;  %s944_s27 = sand.u32 1, %s1368_s30  }
 0x382   : > { %p1666_p8 = scmp.ne.s32.totalorder %s1659_s20, 0  ;;  %s945_s13 = scalar_lea.sflag [#allocation4], %s944_s27 }
 0x384   : > { %p1185_p11 = pnand %p1192_p12, %p1666_p8 }
 0x386   : > { %p1186_p0 = pneg %p1185_p11 }
 0x388   : > { %1363 = dma.done.wait (%p1186_p0), %s945_s13, 128  }
 0x389   : > { %1365 = vsyncadd (%p1186_p0), %s945_s13, 4294967168  ;;  %p21_p1 = scmp.ge.s32.totalorder %s1464_s15, 4   ;;  %s1667_s30 = smov %s1372_s10 }
 0x38a   : > { %s1668_s10 = smov %s1376_s11  ;;  %s1669_s11 = smov %s1475_s18 }
 0x38b   : > { %s1670_s12 = smov %s1464_s15  ;;  %23 = sbr.rel (!%p21_p1) target bundleno = 5 (0x5), region = 100 }
 0x390   :  { %950 = vsyncpa [#allocation3], 1 }
 0x391   :  { %952 = vsyncpa [#allocation3 + $0x1], 1 }
 0x392   :  { %953 = vsyncpa [#allocation6], 1 }
 0x393   :  { %954 = vsyncpa [#allocation4], 1 }
 0x394   :  { %956 = vsyncpa [#allocation4 + $0x1], 1 }

// kernel: tpu_custom_call.1
= control target key start
LH: loop header
LB: loop body
LE: loop exit
PB: predicated region body
PF: predicated region fallthrough
CT: control target
= control target key end

     0   :  { %14 = vsyncpa [#allocation3], 0  ;;  %s1647_s0 = inlined_call_operand.vmem [shape: bf16[128,16], index: 0, kind: input, shape index: {}]   ;;  %s1648_s1 = inlined_call_operand.vmem [shape: bf16[16,128], index: 1, kind: input, shape index: {}]   ;;  %s1649_s2 = inlined_call_operand.vmem [shape: f32[1,128], index: 2, kind: input, shape index: {}]   ;;  %s1650_s3 = inlined_call_operand.vmem [shape: bf16[128,128], index: 3, kind: input, shape index: {}]   ;;  %s1651_s4 = inlined_call_operand.vmem [shape: f32[1,128], index: 4, kind: input, shape index: {}]   ;;  %s1652_s5 = inlined_call_operand.hbm [shape: bf16[128,128], index: 5, kind: input, shape index: {}]   ;;  %s1653_s6 = inlined_call_operand.vmem [shape: f32[1,128], index: 6, kind: input, shape index: {}]   ;;  %s1654_s7 = inlined_call_operand.hbm [shape: bf16[128,128], index: 7, kind: input, shape index: {}]   ;;  %s1655_s8 = inlined_call_operand.vmem [shape: f32[1,128], index: 8, kind: input, shape index: {}]   ;;  %s1656_s9 = inlined_call_operand.hbm [shape: f32[16,128], index: 9, kind: output, shape index: {}]  }
   0x1   :  { %15 = vsyncpa [#allocation6], 0 }
   0x2   :  { %16 = vsyncpa [#allocation4], 0 }
   0x3   :  { %18 = vsyncpa [#allocation4 + $0x1], 0  ;;  %s1439_s30 = smov 0   ;;  %s1441_s10 = smov 0  }
   0x4   :  { %s1443_s11 = smov 0   ;;  %s1445_s12 = smov 0  }
   0x5 LB: > { %s1460_s13 = sadd.s32 4294967295, %s1380_s12   ;;  %s1013_s14 = sadd.s32 4294967294, %s1380_s12   ;;  %s1380_s12 = sphi %s1445_s12, %s1670_s12   ;;  %s1376_s11 = sphi %s1443_s11, %s1669_s11   ;;  %s1372_s10 = sphi %s1441_s10, %s1668_s10   ;;  %s1368_s30 = sphi %s1439_s30, %s1667_s30  }
   0x6   : > { %s1464_s15 = sadd.s32 1, %s1380_s12   ;;  %s225_s16 = sadd.s32 1, %s1376_s11 }
   0x7   : > { %s222_s17 = ssub.s32 %s1380_s12, %s1464_s15  ;;  %p235_p0 = scmp.ne.s32.totalorder %s1376_s11, %s1372_s10 }
   0x8   : > { %p223_p1 = scmp.eq.s32.totalorder %s222_s17, 0  ;;  %p236_p2 = scmp.eq.s32.totalorder %s1460_s13, 1 }
   0x9   : > { %p241_p3 = scmp.ne.s32.totalorder %s1372_s10, %s1368_s30  ;;  %p242_p4 = scmp.eq.s32.totalorder %s1013_s14, 1 }
   0xa   : > { %s1475_s18 = scalar_select %p223_p1, %s1376_s11, %s225_s16  }
   0xb   : > { %p1477_p5 = por %p236_p2, %p235_p0  ;;  %p1481_p6 = por %p242_p4, %p241_p3 }
   0xc   : > { %p1014_p7 = scmp.ge.s32.totalorder %s1380_s12, 1  ;;  %p249_p8 = scmp.lt.s32.totalorder %s1380_s12, 3 }
   0xd   : > { %s1659_s20 = scalar_select %p1481_p6, 1, 0 }
   0xe   : > { %p1657_p9 = scmp.eq.s32.totalorder %s1460_s13, 0  ;;  %p1488_p10 = pnand %p1014_p7, %p249_p8 }
   0xf   : > { %s1382_s22 = smov [#allocation2]   ;;  %s1383_s25 = smov [#allocation5]  }
  0x10   : > { %s273_s23 = sshll.u32 %s1382_s22, 4  ;;  %p1177_p11 = pneg %p1488_p10  ;;  %s274_s23 = int_to_ptr.vmem [resolvable:$true] %s273_s23 }
  0x11   : > { %s289_s26 = sshll.u32 %s1383_s25, 4  ;;  %s1271_s27 = scalar_lea.vmem %s274_s23, 1024  ;;  %s290_s26 = int_to_ptr.vmem [resolvable:$true] %s289_s26 }
  0x12   : > { %p1496_p12 = pnand %p1657_p9, %p1177_p11  ;;  %p1272_p0 = scmp.ne.s32.totalorder %s274_s23, %s1271_s27 }
  0x13   : > { %p1279_p3 = scmp.lt.s32.totalorder %s274_s23, %s274_s23  ;;  %p1280_p4 = scmp.lt.s32.totalorder %s1271_s27, %s1271_s27 }
  0x14   : > { %p1262_p13 = pneg %p1496_p12 }
  0x15   : > { %p1281_p7 = por %p1280_p4, %p1279_p3 }
  0x16   : > { %p1274_p1 = pnand %p1272_p0, %p1262_p13 }
  0x18   : > { %p1275_p2 = pneg %p1274_p1 }
  0x1a   : > { %p1282_p8 = pnand %p1281_p7, %p1275_p2 }
  0x1c   : > { %1285 = shalt.err (!%p1282_p8)
}
  0x1d   : > { %s1384_s28 = smov 64   ;;  %s1385_s29 = smov 4  }
  0x1e   : > { %1180 = dma.hbm_to_vmem [thread:$0]  (!%p1496_p12), %s1652_s5, 1024, %s274_s23, [#allocation3], %s1384_s28, %s1384_s28, %s1385_s29  }
  0x1f   : > { %s1297_s17 = scalar_lea.vmem %s290_s26, 1024  ;;  %p1305_p9 = scmp.lt.s32.totalorder %s290_s26, %s290_s26 }
  0x20   : > { %p1298_p11 = scmp.ne.s32.totalorder %s290_s26, %s1297_s17  ;;  %p1306_p6 = scmp.lt.s32.totalorder %s1297_s17, %s1297_s17 }
  0x22   : > { %p1300_p0 = pnand %p1298_p11, %p1262_p13  ;;  %p1307_p3 = por %p1306_p6, %p1305_p9 }
  0x24   : > { %p1301_p1 = pneg %p1300_p0 }
  0x26   : > { %p1308_p2 = pnand %p1307_p3, %p1301_p1 }
  0x28   : > { %1311 = shalt.err (!%p1308_p2)
}
  0x29   : > { %1183 = dma.hbm_to_vmem [thread:$0]  (!%p1496_p12), %s1654_s7, 1024, %s290_s26, [#allocation6], %s1384_s28, %s1384_s28, %s1385_s29  }
  0x2a   : > { %317 = sbr.rel (%p1488_p10) target bundleno = 897 (0x381), region = 56  ;;  %p1662_p4 = scmp.eq.s32.totalorder (!%p1488_p10), %s1460_s13, 0 }
  0x2f   : > { %1355 = dma.done.wait (%p1662_p4), [#allocation3], 1024   ;;  %p1663_p13 = pmov %p1662_p4 }
  0x30   : > { %p1664_p7 = pmov %p1662_p4 }
  0x31   : > { %1357 = vsyncadd (%p1663_p13), [#allocation3], 4294966272 }
  0x32   : > { %1359 = dma.done.wait (%p1664_p7), [#allocation6], 1024   ;;  %p1665_p6 = pmov %p1662_p4 }
  0x33   : > { %s1022_s23 = sshll.u32 %s1460_s13, 3  ;;  %v1231_v0 = vld [vmem:[%s1648_s1] sm:$0xff]   ;;  %vm407_vm0 = vcmask 130048   ;;  %v1236_v5 = vld [vmem:[%s1650_s3 + $0x38] sm:$0xff]   ;;  %v1386_v6 = vmov 0.0   ;;  %v1237_v7 = vld [vmem:[%s1650_s3 + $0x30] sm:$0xff]  }
  0x34   : > { %1361 = vsyncadd (%p1665_p6), [#allocation6], 4294966272  ;;  %p358_p9 = scmp.lt.s32.totalorder %s1022_s23, 15  ;;  %1097 = vmatprep.subr.bf16.mxu0 %v1231_v0  ;;  %1107 = vmatprep.subr.bf16.mxu1 %v1386_v6  ;;  %v1238_v8 = vld [vmem:[%s1650_s3 + $0x28] sm:$0xff]   ;;  %v1239_v9 = vld [vmem:[%s1650_s3 + $0x20] sm:$0xff]   ;;  %vm1387_vm1 = vmmov 0  }
  0x35   : > { %1098 = vmatpush3.bf16.msra.mxu0 %v1231_v0  ;;  %1108 = vmatpush3.bf16.msra.mxu1 %v1236_v5  ;;  %v1240_v10 = vld [vmem:[%s1650_s3 + $0x18] sm:$0xff]   ;;  %v1241_v11 = vld [vmem:[%s1650_s3 + $0x10] sm:$0xff]   ;;  %v1242_v12 = vld [vmem:[%s1650_s3 + $0x8] sm:$0xff]   ;;  %vm588_vm2 = vcmask 1041409   ;;  %vm590_vm3 = vcmask 1042434   ;;  %vm592_vm4 = vcmask 1043459  }
  0x36   : > { %s1672_s23 = smov (!%p358_p9, %s1022_s23), 15  ;;  %1127 = vmatprep.subr.bf16.mxu0 %v1386_v6  ;;  %1109 = vmatprep.subr.bf16.mxu1 %v1386_v6  ;;  %v1243_v13 = vld [vmem:[%s1650_s3] sm:$0xff]   ;;  %v1244_v14 = vld [vmem:[#allocation2 + $0x38] sm:$0xff]   ;;  %v1245_v15 = vld [vmem:[#allocation2 + $0x30] sm:$0xff]   ;;  %vm594_vm5 = vcmask 1044484   ;;  %vm596_vm6 = vcmask 1045509  }
  0x37   : > { %s1023_s24 = sshll.u32 %s1672_s23, 2  ;;  %1123 = vmatprep.mubr.msk.bf16.mxu1 %vm1387_vm1, %v1386_v6  ;;  %v1246_v16 = vld [vmem:[#allocation2 + $0x28] sm:$0xff]   ;;  %v1247_v17 = vld [vmem:[#allocation2 + $0x20] sm:$0xff]   ;;  %v1248_v18 = vld [vmem:[#allocation2 + $0x18] sm:$0xff]   ;;  %vm598_vm7 = vcmask 1046534   ;;  %vm600_vm8 = vcmask 1047559  }
  0x38   : > { %s361_s27 = scalar_lea.vmem %s1647_s0, %s1023_s24  ;;  %v1249_v19 = vld [vmem:[#allocation2 + $0x10] sm:$0xff]   ;;  %v1250_v20 = vld [vmem:[#allocation2 + $0x8] sm:$0xff]   ;;  %v1024_v21 = vld [vmem:[%s1649_s2] ss:$0 sm:$0xff]  ;;  %s354_s28 = sand.u32 1, %s1372_s10  }
  0x39   : > { %v1232_v1 = vld [vmem:[%s361_s27] sm:$0xff]   ;;  %v1233_v2 = vld [vmem:[%s361_s27 + $0x8] sm:$0xff]   ;;  %v1234_v3 = vld [vmem:[%s361_s27 + $0x10] sm:$0xff]   ;;  %1110 = vmatpush3.bf16.msra.mxu1 %v1237_v7  ;;  %s1021_s29 = sshll.u32 %s354_s28, 3  ;;  %s1062_s17 = sshll.u32 %s1460_s13, 7 }
  0x3a   : > { %1099 = vmatprep.mubr.msk.bf16.mxu0 %vm407_vm0, %v1232_v1  ;;  %v1235_v4 = vld [vmem:[%s361_s27 + $0x18] sm:$0xff]   ;;  %1111 = vmatprep.subr.bf16.mxu1 %v1386_v6  ;;  %s356_s22 = scalar_lea.vmem [#allocation7], %s1021_s29  ;;  %s1606_s26 = scalar_lea.hbm %s1656_s9, %s1062_s17 }
  0x3b   : > { %1100 = vmatmul.mubr.msk.bf16.vlgmr.msra.gmra.mxu0 %vm407_vm0, %v1233_v2  ;;  %s932_s25 = sshll.u32 %s356_s22, 4  ;;  %s919_s21 = scalar_lea.sflag [#allocation4], %s354_s28  ;;  %s1608_s25 = int_to_ptr.vmem [resolvable:$true] %s932_s25 }
  0x3c   : > { %1103 = vmatprep.mubr.msk.bf16.mxu0 %vm407_vm0, %v1234_v3  ;;  %1128 = vmatpush3.bf16.msra.mxu0 %v1244_v14  ;;  %s1312_s27 = scalar_lea.vmem %s1608_s25, 128  ;;  %s1388_s13 = smov [#allocation7]  }
  0x3d   : > { %1112 = vmatpush3.bf16.msra.mxu1 %v1238_v8  ;;  %1129 = vmatprep.subr.bf16.mxu0 %v1386_v6  ;;  %p1313_p10 = scmp.ne.s32.totalorder %s1608_s25, %s1312_s27  ;;  %s1316_s29 = sshll.u32 %s1388_s13, 4  ;;  %s1317_s29 = int_to_ptr.vmem [resolvable:$false] %s1316_s29 }
  0x3e   : > { %1113 = vmatprep.subr.bf16.mxu1 %v1386_v6  ;;  %s1318_s14 = scalar_lea.vmem %s1317_s29, 256  ;;  %p1319_p11 = scmp.lt.s32.totalorder %s1608_s25, %s1317_s29 }
  0x3f   : > { %p1314_p12 = pnand %p1313_p10, %p1477_p5  ;;  %p1320_p0 = scmp.lt.s32.totalorder %s1318_s14, %s1312_s27 }
  0x40   : > { %1130 = vmatpush3.bf16.msra.mxu0 %v1245_v15 }
  0x41   : > { %1114 = vmatpush3.bf16.msra.mxu1 %v1239_v9  ;;  %1131 = vmatprep.subr.bf16.mxu0 %v1386_v6  ;;  %p1315_p8 = pneg %p1314_p12  ;;  %p1321_p1 = por %p1320_p0, %p1319_p11 }
  0x42   : > { %1115 = vmatprep.subr.bf16.mxu1 %v1386_v6 }
  0x43   : > { %1104 = vmatmul.mubr.msk.bf16.gmra.mxu0 %vm407_vm0, %v1235_v4  ;;  %p1322_p3 = pnand %p1321_p1, %p1315_p8 }
  0x44   : > { %1143 = vmatprep.mubr.msk.bf16.mxu0 %vm1387_vm1, %v1386_v6  ;;  %1132 = vmatpush3.bf16.msra.mxu0 %v1246_v16 }
  0x45   : > { %1116 = vmatpush3.bf16.msra.mxu1 %v1240_v10  ;;  %1133 = vmatprep.subr.bf16.mxu0 %v1386_v6 }
  0x46   : > { %1117 = vmatprep.subr.bf16.mxu1 %v1386_v6 }
  0x48   : > { %1134 = vmatpush3.bf16.msra.mxu0 %v1247_v17 }
  0x49   : > { %1118 = vmatpush3.bf16.msra.mxu1 %v1241_v11  ;;  %1135 = vmatprep.subr.bf16.mxu0 %v1386_v6 }
  0x4a   : > { %1119 = vmatprep.subr.bf16.mxu1 %v1386_v6 }
  0x4c   : > { %1136 = vmatpush3.bf16.msra.mxu0 %v1248_v18 }
  0x4d   : > { %1120 = vmatpush3.bf16.msra.mxu1 %v1242_v12  ;;  %1137 = vmatprep.subr.bf16.mxu0 %v1386_v6 }
  0x4e   : > { %1121 = vmatprep.subr.bf16.mxu1 %v1386_v6 }
  0x50   : > { %1138 = vmatpush3.bf16.msra.mxu0 %v1249_v19 }
  0x51   : > { %1122 = vmatpush3.bf16.msra.mxu1 %v1243_v13  ;;  %1139 = vmatprep.subr.bf16.mxu0 %v1386_v6 }
  0x52   : > { %1147 = vmatprep.subr.bf16.mxu1 %v1386_v6 }
  0x54   : > { %1140 = vmatpush3.bf16.msra.mxu0 %v1250_v20 }
  0x55   : > { %1141 = vmatprep.subr.bf16.mxu0 %v1386_v6 }
  0xfb   : > { %v1101_v22 = vpop.f32.mrf.mxu0 }
  0xfc   : > { %v463_v23 = vadd.f32 %v1101_v22, %v1024_v21 }
  0xfd   : > { %v454_v24 = vpop.f32.mrf.mxu0 }
  0xfe   : > { %v487_v25 = vmax.f32 %v463_v23, 0.0  ;;  %v455_v26 = vadd.f32 %v1024_v21, %v454_v24 }
  0xff   : > { %v1102_v27 = vpop.f32.mrf.mxu0 }
 0x100   : > { %v505_v28 = vrot.slane %v487_v25, 4  ;;  %v485_v29 = vmax.f32 %v455_v26, 0.0  ;;  %v466_v30 = vadd.f32 %v1102_v27, %v1024_v21 }
 0x101   : > { %v457_v31 = vpop.f32.mrf.mxu0 }
 0x102   : > { %v506_v32 = vadd.f32 %v505_v28, %v487_v25  ;;  %v493_v33 = vrot.slane %v485_v29, 4  ;;  %v488_v34 = vmax.f32 %v466_v30, 0.0  ;;  %v458_v35 = vadd.f32 %v1024_v21, %v457_v31 }
 0x103   : > { %v1105_v36 = vpop.f32.mrf.mxu0 }
 0x104   : > { %v507_v37 = vrot.slane %v506_v32, 2  ;;  %v494_v38 = vadd.f32 %v493_v33, %v485_v29  ;;  %v511_v39 = vrot.slane %v488_v34, 4  ;;  %v486_v40 = vmax.f32 %v458_v35, 0.0 }
 0x105   : > { %v479_v41 = vadd.f32 %v1105_v36, %v1024_v21  ;;  %v470_v42 = vpop.f32.mrf.mxu0 }
 0x106   : > { %v508_v43 = vadd.f32 %v507_v37, %v506_v32  ;;  %v495_v44 = vrot.slane %v494_v38, 2  ;;  %v512_v45 = vadd.f32 %v511_v39, %v488_v34  ;;  %v499_v46 = vrot.slane %v486_v40, 4 }
 0x107   : > { %v491_v47 = vmax.f32 %v479_v41, 0.0  ;;  %v471_v48 = vadd.f32 %v1024_v21, %v470_v42  ;;  %v1106_v49 = vpop.f32.mrf.mxu0 }
 0x108   : > { %v496_v50 = vadd.f32 %v495_v44, %v494_v38  ;;  %v513_v51 = vrot.slane %v512_v45, 2  ;;  %v500_v52 = vadd.f32 %v499_v46, %v486_v40  ;;  %v482_v55 = vadd.f32 %v1106_v49, %v1024_v21 }
 0x109   : > { %v529_v53 = vrot.slane %v491_v47, 4  ;;  %v489_v54 = vmax.f32 %v471_v48, 0.0  ;;  %v473_v56 = vpop.f32.mrf.mxu0  ;;  %v509_v57 = vrot.slane %v508_v43, 1 }
 0x10a   : > { %v497_v58 = vrot.slane %v496_v50, 1  ;;  %v514_v59 = vadd.f32 %v513_v51, %v512_v45  ;;  %v501_v60 = vrot.slane %v500_v52, 2  ;;  %v492_v63 = vmax.f32 %v482_v55, 0.0  ;;  %v1251_v55 = vld [vmem:[#allocation2] sm:$0xff]  }
 0x10b   : > { %v530_v61 = vadd.f32 %v529_v53, %v491_v47  ;;  %v517_v62 = vrot.slane %v489_v54, 4  ;;  %v474_v0 = vadd.f32 %v1024_v21, %v473_v56  ;;  %v510_v8 = vadd.f32 %v509_v57, %v508_v43  ;;  %1142 = vmatpush3.bf16.msra.mxu0 %v1251_v55  ;;  %v1252_v56 = vld [vmem:[#allocation5 + $0x38] sm:$0xff]   ;;  %v1253_v57 = vld [vmem:[#allocation5 + $0x30] sm:$0xff]  }
 0x10c   : > { %v498_v1 = vadd.f32 %v497_v58, %v496_v50  ;;  %v502_v2 = vadd.f32 %v501_v60, %v500_v52  ;;  %v535_v5 = vrot.slane %v492_v63, 4  ;;  %v515_v9 = vrot.slane %v514_v59, 1  ;;  %v1254_v58 = vld [vmem:[#allocation5 + $0x28] sm:$0xff]   ;;  %v1256_v60 = vld [vmem:[#allocation5 + $0x18] sm:$0xff]  }
 0x10d   : > { %v531_v3 = vrot.slane %v530_v61, 2  ;;  %v518_v4 = vadd.f32 %v517_v62, %v489_v54  ;;  %v490_v7 = vmax.f32 %v474_v0, 0.0  ;;  %v543_v20 = vpack.c.bf16 %v510_v8, %v510_v8  ;;  %v1034_v62 = vld [vmem:[%s1651_s4] ss:$0 sm:$0xff] }
 0x10e   : > { %v503_v10 = vrot.slane %v502_v2, 1  ;;  %v536_v13 = vadd.f32 %v535_v5, %v492_v63  ;;  %v541_v15 = vpack.c.bf16 %v498_v1, %v498_v1  ;;  %v516_v21 = vadd.f32 %v515_v9, %v514_v59  ;;  %v1255_v59 = vld [vmem:[#allocation5 + $0x20] sm:$0xff]   ;;  %v1258_v5 = vld [vmem:[#allocation5 + $0x8] sm:$0xff]  }
 0x10f   : > { %v532_v11 = vadd.f32 %v531_v3, %v530_v61  ;;  %v519_v12 = vrot.slane %v518_v4, 2  ;;  %v523_v14 = vrot.slane %v490_v7, 4  ;;  %v582_v34 = vunpack.c.l.b16 %v543_v20  ;;  %v1257_v61 = vld [vmem:[#allocation5 + $0x10] sm:$0xff]   ;;  %v1043_v8 = vld [vmem:[%s1653_s6] ss:$0 sm:$0xff] }
 0x110   : > { %v504_v16 = vadd.f32 %v503_v10, %v502_v2  ;;  %v537_v18 = vrot.slane %v536_v13, 2  ;;  %v580_v27 = vunpack.c.l.b16 %v541_v15  ;;  %v544_v32 = vpack.c.bf16 %v516_v21, %v516_v21 }
 0x111   : > { %v520_v17 = vadd.f32 %v519_v12, %v518_v4  ;;  %v524_v19 = vadd.f32 %v523_v14, %v490_v7  ;;  %v533_v23 = vrot.slane %v532_v11, 1  ;;  %v1259_v7 = vld [vmem:[#allocation5] sm:$0xff]  }
 0x112   : > { %v542_v22 = vpack.c.bf16 %v504_v16, %v504_v16  ;;  %v538_v25 = vadd.f32 %v537_v18, %v536_v13  ;;  %v583_v40 = vunpack.c.l.b16 %v544_v32 }
 0x113   : > { %v521_v24 = vrot.slane %v520_v17, 1  ;;  %v525_v26 = vrot.slane %v524_v19, 2  ;;  %v534_v35 = vadd.f32 %v533_v23, %v532_v11 }
 0x114   : > { %v581_v28 = vunpack.c.l.b16 %v542_v22  ;;  %v539_v30 = vrot.slane %v538_v25, 1 }
 0x115   : > { %v522_v29 = vadd.f32 %v521_v24, %v520_v17  ;;  %v526_v31 = vadd.f32 %v525_v26, %v524_v19  ;;  %v547_v42 = vpack.c.bf16 %v534_v35, %v534_v35 }
 0x116   : > { %v589_v33 = vsel %vm588_vm2, %v581_v28, %v580_v27  ;;  %v540_v37 = vadd.f32 %v539_v30, %v538_v25 }
 0x117   : > { %v545_v36 = vpack.c.bf16 %v522_v29, %v522_v29  ;;  %v527_v38 = vrot.slane %v526_v31, 1  ;;  %v591_v39 = vsel %vm590_vm3, %v582_v34, %v589_v33  ;;  %v586_v48 = vunpack.c.l.b16 %v547_v42 }
 0x118   : > { %v548_v44 = vpack.c.bf16 %v540_v37, %v540_v37  ;;  %v593_v46 = vsel %vm592_vm4, %v583_v40, %v591_v39 }
 0x119   : > { %v528_v41 = vadd.f32 %v527_v38, %v526_v31  ;;  %v584_v43 = vunpack.c.l.b16 %v545_v36 }
 0x11a   : > { %v587_v50 = vunpack.c.l.b16 %v548_v44 }
 0x11b   : > { %v546_v45 = vpack.c.bf16 %v528_v41, %v528_v41  ;;  %v595_v49 = vsel %vm594_vm5, %v584_v43, %v593_v46 }
 0x11d   : > { %v585_v47 = vunpack.c.l.b16 %v546_v45 }
 0x11f   : > { %v597_v51 = vsel %vm596_vm6, %v585_v47, %v595_v49 }
 0x120   : > { %v599_v52 = vsel %vm598_vm7, %v586_v48, %v597_v51 }
 0x121   : > { %v601_v53 = vsel %vm600_vm8, %v587_v50, %v599_v52 }
 0x122   : > { %v602_v54 = vpack.c.b16 %v601_v53, %v601_v53 }
 0x124   : > { %1124 = vmatmul.mubr.bf16.vlgmr.msra.gmra.mxu1 %v602_v54 }
 0x125   : > { %1163 = vmatprep.mubr.msk.bf16.mxu1 %vm1387_vm1, %v1386_v6  ;;  %1148 = vmatpush3.bf16.msra.mxu1 %v1252_v56 }
 0x126   : > { %1149 = vmatprep.subr.bf16.mxu1 %v1386_v6 }
 0x129   : > { %1150 = vmatpush3.bf16.msra.mxu1 %v1253_v57 }
 0x12a   : > { %1151 = vmatprep.subr.bf16.mxu1 %v1386_v6 }
 0x12d   : > { %1152 = vmatpush3.bf16.msra.mxu1 %v1254_v58 }
 0x12e   : > { %1153 = vmatprep.subr.bf16.mxu1 %v1386_v6 }
 0x131   : > { %1154 = vmatpush3.bf16.msra.mxu1 %v1255_v59 }
 0x132   : > { %1155 = vmatprep.subr.bf16.mxu1 %v1386_v6 }
 0x135   : > { %1156 = vmatpush3.bf16.msra.mxu1 %v1256_v60 }
 0x136   : > { %1157 = vmatprep.subr.bf16.mxu1 %v1386_v6 }
 0x139   : > { %1158 = vmatpush3.bf16.msra.mxu1 %v1257_v61 }
 0x13a   : > { %1159 = vmatprep.subr.bf16.mxu1 %v1386_v6 }
 0x13d   : > { %1160 = vmatpush3.bf16.msra.mxu1 %v1258_v5 }
 0x13e   : > { %1161 = vmatprep.subr.bf16.mxu1 %v1386_v6  ;;  %v1052_v6 = vld [vmem:[%s1655_s8] ss:$0 sm:$0xff] }
 0x141   : > { %1162 = vmatpush3.bf16.msra.mxu1 %v1259_v7 }
 0x1e4   : > { %v686_v63 = vpop.f32.mrf.mxu1 }
 0x1e5   : > { %v687_v0 = vadd.f32 %v1034_v62, %v686_v63 }
 0x1e6   : > { %v1125_v1 = vpop.f32.mrf.mxu1 }
 0x1e7   : > { %v692_v2 = vpack.c.bf16 %v687_v0, %v687_v0 }
 0x1e8   : > { %v689_v3 = vpop.f32.mrf.mxu1 }
 0x1e9   : > { %1144 = vmatmul.mubr.bf16.vlgmr.msra.gmra.mxu0 %v692_v2 }
 0x1ea   : > { %v1126_v4 = vpop.f32.mrf.mxu1 }
 0x2a9   : > { %v798_v9 = vpop.f32.mrf.mxu0 }
 0x2aa   : > { %v799_v10 = vadd.f32 %v1043_v8, %v798_v9 }
 0x2ab   : > { %v1145_v11 = vpop.f32.mrf.mxu0 }
 0x2ac   : > { %v804_v12 = vmax.f32 %v799_v10, 0.0 }
 0x2ad   : > { %v801_v13 = vpop.f32.mrf.mxu0 }
 0x2ae   : > { %v805_v14 = vpack.c.bf16 %v804_v12, %v804_v12 }
 0x2af   : > { %v1146_v15 = vpop.f32.mrf.mxu0 }
 0x2b0   : > { %1164 = vmatmul.mubr.bf16.vlgmr.msra.gmra.mxu1 %v805_v14 }
 0x370   : > { %v911_v16 = vpop.f32.mrf.mxu1 }
 0x371   : > { %v912_v17 = vadd.f32 %v1052_v6, %v911_v16 }
 0x372   : > { %v1165_v18 = vpop.f32.mrf.mxu1 }
 0x373   : > { %917 = vst [vmem:[%s356_s22] sm:$0xff] %v912_v17 }
 0x374   : > { %v914_v19 = vpop.f32.mrf.mxu1 }
 0x375   : > { %1325 = shalt.err (!%p1322_p3)
}
 0x376   : > { %s1326_s16 = scalar_lea.hbm %s1606_s26, 128  ;;  %s1330_s22 = scalar_lea.hbm %s1656_s9, 256 }
 0x377   : > { %p1327_p2 = scmp.ne.s32.totalorder %s1606_s26, %s1326_s16  ;;  %p1331_p7 = scmp.lt.s32.totalorder %s1606_s26, %s1656_s9 }
 0x378   : > { %p1332_p6 = scmp.lt.s32.totalorder %s1330_s22, %s1326_s16 }
 0x379   : > { %p1328_p4 = pnand %p1327_p2, %p1477_p5 }
 0x37a   : > { %p1333_p9 = por %p1332_p6, %p1331_p7 }
 0x37b   : > { %p1329_p13 = pneg %p1328_p4 }
 0x37d   : > { %p1334_p10 = pnand %p1333_p9, %p1329_p13 }
 0x37f   : > { %1337 = shalt.err (!%p1334_p10)
}
 0x380   : > { %1175 = dma.vmem_to_hbm [thread:$0]  (%p1477_p5), %s1608_s25, 128, %s1606_s26, %s919_s21   ;;  %v1166_v20 = vpop.f32.mrf.mxu1 }
 0x381 PF: > { %p1192_p12 = scmp.ge.s32.totalorder %s1380_s12, 2  ;;  %s944_s27 = sand.u32 1, %s1368_s30  }
 0x382   : > { %p1666_p8 = scmp.ne.s32.totalorder %s1659_s20, 0  ;;  %s945_s13 = scalar_lea.sflag [#allocation4], %s944_s27 }
 0x384   : > { %p1185_p11 = pnand %p1192_p12, %p1666_p8 }
 0x386   : > { %p1186_p0 = pneg %p1185_p11 }
 0x388   : > { %1363 = dma.done.wait (%p1186_p0), %s945_s13, 128  }
 0x389   : > { %1365 = vsyncadd (%p1186_p0), %s945_s13, 4294967168  ;;  %p21_p1 = scmp.ge.s32.totalorder %s1464_s15, 4   ;;  %s1667_s30 = smov %s1372_s10 }
 0x38a   : > { %s1668_s10 = smov %s1376_s11  ;;  %s1669_s11 = smov %s1475_s18 }
 0x38b   : > { %s1670_s12 = smov %s1464_s15  ;;  %23 = sbr.rel (!%p21_p1) target bundleno = 5 (0x5), region = 100 }
 0x390   :  { %950 = vsyncpa [#allocation3], 1 }
 0x391   :  { %952 = vsyncpa [#allocation3 + $0x1], 1 }
 0x392   :  { %953 = vsyncpa [#allocation6], 1 }
 0x393   :  { %954 = vsyncpa [#allocation4], 1 }
 0x394   :  { %956 = vsyncpa [#allocation4 + $0x1], 1 }

</bundles_post_ra>
